<compile_context>
chip_gen: v5e
topology: v5e:2x2
jax: 0.10.0
libtpu: 0.0.40
codegen_flags: <defaults>
</compile_context>

<pallas_src>
import functools

import jax
import jax.numpy as jnp
from jax.experimental import pallas as pl
from jax.experimental.pallas import tpu as pltpu

_LANE = 128
_MAX_BATCH_TILE = 512
# Memory-space enum (newer jax: pltpu.MemorySpace; older: pltpu.TPUMemorySpace).
_MEM_SPACE = getattr(pltpu, "MemorySpace", None) or getattr(pltpu, "TPUMemorySpace")


def _round_up(x: int, m: int) -> int:
    return ((x + m - 1) // m) * m


# ------------------------------ fused kernel ---------------------------------

def _fused_actor_critic_kernel(x_ref, wf_ref, wt_ref, bt_ref, wh0_ref, wh_ref, bh_ref,
                               out_ref, *, n_shared: int, n_head: int):
    """x: (TB, D0) f32; wf: (D0, W) bf16; wt: (n_tr, W, W) bf16; bt: (n_shared, W) f32;
       wh0: (W, HW) bf16; wh: (n_hr, HW, HW) bf16; bh: (n_head, HW) f32;
       out: (TB, HW) f32 -- value lanes [0, value_out), policy lanes [policy_off, ...)."""
    bf16 = jnp.bfloat16
    f32 = jnp.float32

    # ---- shared trunk (ReLU after every layer); computed ONCE for both heads ----
    acc = jnp.dot(x_ref[...].astype(bf16), wf_ref[...], preferred_element_type=f32)
    act = jnp.maximum(acc + bt_ref[0:1, :], 0.0)
    for li in range(1, n_shared):
        acc = jnp.dot(act.astype(bf16), wt_ref[li - 1], preferred_element_type=f32)
        act = jnp.maximum(acc + bt_ref[li:li + 1, :], 0.0)

    # ---- fused value+policy head chain (block-diagonal weights) ----
    # ReLU after every fused head step except the last (matches both heads).
    h = jnp.dot(act.astype(bf16), wh0_ref[...], preferred_element_type=f32) + bh_ref[0:1, :]
    if n_head > 1:
        h = jnp.maximum(h, 0.0)
    for j in range(1, n_head):
        h = jnp.dot(h.astype(bf16), wh_ref[j - 1], preferred_element_type=f32) + bh_ref[j:j + 1, :]
        if j < n_head - 1:
            h = jnp.maximum(h, 0.0)

    out_ref[...] = h.astype(out_ref.dtype)


# --------------------------- parameter creation ------------------------------

def init_linear_params(key, in_dim, out_dim):
    """Deterministic init mimicking PyTorch nn.Linear default (uniform bound)."""
    kw, kb = jax.random.split(key)
    bound = 1.0 / jnp.sqrt(jnp.float32(in_dim))
    w = jax.random.uniform(kw, (out_dim, in_dim), jnp.float32, -bound, bound)
    b = jax.random.uniform(kb, (out_dim,), jnp.float32, -bound, bound)
    return w, b


def init_actor_critic_params(key, shared_dims, value_dims, policy_dims):
    params = {"shared": [], "value": [], "policy": []}
    for i in range(len(shared_dims) - 1):
        key, sub = jax.random.split(key)
        params["shared"].append(init_linear_params(sub, shared_dims[i], shared_dims[i + 1]))
    v_dims = [shared_dims[-1]] + list(value_dims)
    for i in range(len(v_dims) - 1):
        key, sub = jax.random.split(key)
        params["value"].append(init_linear_params(sub, v_dims[i], v_dims[i + 1]))
    p_dims = [shared_dims[-1]] + list(policy_dims)
    for i in range(len(p_dims) - 1):
        key, sub = jax.random.split(key)
        params["policy"].append(init_linear_params(sub, p_dims[i], p_dims[i + 1]))
    return params


def prepare_fused_params(params):
    """One-time prep: transpose (out,in)->(in,out), cast weights to bf16,
    zero-pad the trunk to its own lane width W, and fuse the two heads into a
    single block-diagonal chain with lane width HW (value lanes first, policy
    lanes at offset BV).  Shorter head gets exact identity prefix layers."""
    f32 = jnp.float32
    shared = [(jnp.asarray(w, f32), jnp.asarray(b, f32)) for (w, b) in params["shared"]]
    value = [(jnp.asarray(w, f32), jnp.asarray(b, f32)) for (w, b) in params["value"]]
    policy = [(jnp.asarray(w, f32), jnp.asarray(b, f32)) for (w, b) in params["policy"]]
    n_shared, dv, dp = len(shared), len(value), len(policy)
    assert n_shared >= 1 and dv >= 1 and dp >= 1
    n_head = max(dv, dp)

    d0 = shared[0][0].shape[1]
    trunk_out = shared[-1][0].shape[0]
    W = _round_up(max(w.shape[0] for (w, _) in shared), _LANE)   # trunk lane width

    def block_widths(head, depth):
        # Lane width of this head's block after each fused head step.
        return [trunk_out if j < n_head - depth else head[j - (n_head - depth)][0].shape[0]
                for j in range(n_head)]

    vw = block_widths(value, dv)
    pw = block_widths(policy, dp)
    BV, BP = max(vw), max(pw)
    HW = _round_up(BV + BP, _LANE)                               # fused head lane width

    def pad_wt(w, din_pad, dout_pad):
        wt = jnp.transpose(w)                                    # (in, out)
        return jnp.pad(wt, ((0, din_pad - wt.shape[0]), (0, dout_pad - wt.shape[1])))

    # Trunk (shared) layers.
    w_first = pad_wt(shared[0][0], d0, W).astype(jnp.bfloat16)   # (d0, W)
    if n_shared > 1:
        w_trunk_rest = jnp.stack([pad_wt(w, W, W) for (w, _) in shared[1:]]).astype(jnp.bfloat16)
    else:
        w_trunk_rest = jnp.zeros((1, W, W), jnp.bfloat16)        # unused dummy
    b_trunk = jnp.stack([jnp.pad(b, (0, W - b.shape[0])) for (_, b) in shared]).astype(f32)

    # Fused (block-diagonal) head chain.
    def head_layer(head, depth, j):
        k = j - (n_head - depth)
        if k < 0:   # identity prefix: trunk is post-ReLU so this is exact
            return jnp.eye(trunk_out, dtype=f32), jnp.zeros((trunk_out,), f32)
        w, b = head[k]
        return jnp.transpose(w), b                               # (in, out), (out,)

    def fused_step(j):
        din = W if j == 0 else HW
        p_in_off = 0 if j == 0 else BV                           # step 0 reads the trunk
        wv, bv = head_layer(value, dv, j)
        wp, bp = head_layer(policy, dp, j)
        wmat = jnp.zeros((din, HW), f32)
        wmat = wmat.at[0:wv.shape[0], 0:wv.shape[1]].set(wv)
        wmat = wmat.at[p_in_off:p_in_off + wp.shape[0], BV:BV + wp.shape[1]].set(wp)
        bias = jnp.zeros((HW,), f32)
        bias = bias.at[0:bv.shape[0]].set(bv)
        bias = bias.at[BV:BV + bp.shape[0]].set(bp)
        return wmat, bias

    steps = [fused_step(j) for j in range(n_head)]
    w_head_first = steps[0][0].astype(jnp.bfloat16)              # (W, HW)
    if n_head > 1:
        w_head_rest = jnp.stack([s[0] for s in steps[1:]]).astype(jnp.bfloat16)  # (n_head-1, HW, HW)
    else:
        w_head_rest = jnp.zeros((1, HW, HW), jnp.bfloat16)       # unused dummy
    b_head = jnp.stack([s[1] for s in steps]).astype(f32)        # (n_head, HW)

    return {
        "w_first": w_first, "w_trunk_rest": w_trunk_rest, "b_trunk": b_trunk,
        "w_head_first": w_head_first, "w_head_rest": w_head_rest, "b_head": b_head,
        "W": W, "HW": HW, "d0": d0, "n_shared": n_shared, "n_head": n_head,
        "value_out": value[-1][0].shape[0], "policy_out": policy[-1][0].shape[0],
        "value_off": 0, "policy_off": BV,
    }


# ------------------------------ forward pass ---------------------------------

def _fused_pallas_call(fused, obs):
    B, D0 = obs.shape
    assert D0 == fused["d0"]
    W, HW = fused["W"], fused["HW"]
    n_tr = fused["w_trunk_rest"].shape[0]
    n_hr = fused["w_head_rest"].shape[0]

    TB = B if B <= _MAX_BATCH_TILE else _MAX_BATCH_TILE          # batch tile (full or mult. of 8)
    grid = (pl.cdiv(B, TB),)

    # Explicit VMEM budget: params resident once (unblocked VMEM operands),
    # obs/output tiles double-buffered by the pipeline.
    param_bytes = 2 * (D0 * W + n_tr * W * W + W * HW + n_hr * HW * HW)   # bf16 weights
    param_bytes += 4 * (int(fused["b_trunk"].size) + int(fused["b_head"].size))
    io_bytes = 2 * 4 * (TB * D0 + TB * HW)                                # f32, double-buffered
    vmem_limit = max((3 * (param_bytes + io_bytes)) // 2 + (4 << 20), 16 << 20)

    kernel = functools.partial(_fused_actor_critic_kernel,
                               n_shared=fused["n_shared"], n_head=fused["n_head"])

    def resident():
        # Whole array lives in VMEM exactly once: no per-step double-buffering
        # of the stacked weights (same effect the review wanted from Buffered(1)).
        return pl.BlockSpec(memory_space=_MEM_SPACE.VMEM)

    return pl.pallas_call(
        kernel,
        out_shape=jax.ShapeDtypeStruct((B, HW), jnp.float32),
        grid_spec=pltpu.PrefetchScalarGridSpec(
            num_scalar_prefetch=0,
            grid=grid,
            in_specs=[
                pl.BlockSpec((TB, D0), lambda i: (i, 0)),   # obs batch tile
                resident(),   # w_first       (D0, W)        bf16
                resident(),   # w_trunk_rest  (n_tr, W, W)   bf16
                resident(),   # b_trunk       (n_shared, W)  f32
                resident(),   # w_head_first  (W, HW)        bf16
                resident(),   # w_head_rest   (n_hr, HW, HW) bf16
                resident(),   # b_head        (n_head, HW)   f32
            ],
            out_specs=pl.BlockSpec((TB, HW), lambda i: (i, 0)),  # fused lane-dense output
        ),
        compiler_params=pltpu.CompilerParams(
            # TODO(synk): on v7x, if profiling shows one TensorCore idle, switch
            # this batch axis to pltpu.CORE_PARALLEL (weights are then resident twice).
            dimension_semantics=("parallel",),
            vmem_limit_bytes=int(vmem_limit),
        ),
    )(obs, fused["w_first"], fused["w_trunk_rest"], fused["b_trunk"],
      fused["w_head_first"], fused["w_head_rest"], fused["b_head"])


def actor_critic_forward_both(fused, obs):
    """Single fused kernel launch; returns (policy, value)."""
    out = _fused_pallas_call(fused, obs)
    policy = out[:, fused["policy_off"]:fused["policy_off"] + fused["policy_out"]]
    value = out[:, fused["value_off"]:fused["value_off"] + fused["value_out"]]
    return policy, value


def actor_critic_forward(fused, obs, calculate_policy=True):
    """Matches ActorCriticNetwork.forward semantics (one head returned).
    With the block-diagonal head fusion the second head is essentially free,
    so no separate skip-one-head kernel variant is needed."""
    policy, value = actor_critic_forward_both(fused, obs)
    return policy if calculate_policy else value


# --------------------------------- reference ----------------------------------

def ref_forward(params, obs, calculate_policy, matmul_dtype=jnp.float32):
    """Pure-JAX reference.  With matmul_dtype=bf16 it mirrors the kernel's
    operand dtypes exactly (bf16 operands, f32 accumulation, f32 bias/ReLU)."""
    def linear(a, w, b):
        y = jnp.dot(a.astype(matmul_dtype), jnp.transpose(w).astype(matmul_dtype),
                    preferred_element_type=jnp.float32)
        return y + b
    act = obs
    for (w, b) in params["shared"]:
        act = jnp.maximum(linear(act, w, b), 0.0)
    head = params["policy"] if calculate_policy else params["value"]
    for (w, b) in head[:-1]:
        act = jnp.maximum(linear(act, w, b), 0.0)
    w, b = head[-1]
    return linear(act, w, b)


def _check(name, got, want, atol, rtol):
    got = jnp.asarray(got, jnp.float32)
    want = jnp.asarray(want, jnp.float32)
    if not bool(jnp.allclose(got, want, atol=atol, rtol=rtol)):
        err = float(jnp.max(jnp.abs(got - want)))
        raise AssertionError(f"{name}: max abs err {err:.3e} (atol={atol}, rtol={rtol})")


# ----------------------------------- main ------------------------------------

if __name__ == "__main__":
    key = jax.random.PRNGKey(0)

    # Small sizes consistent with the module's forward pass.
    batch = 2
    shared_dims = [16, 32, 32]   # obs_dim=16 -> 32 -> 32
    value_dims = [32, 1]         # value head: 32 -> 32 -> 1
    policy_dims = [32, 8]        # policy head: 32 -> 32 -> 8 actions

    key, pkey, xkey, bkey = jax.random.split(key, 4)
    params = init_actor_critic_params(pkey, shared_dims, value_dims, policy_dims)
    fused = prepare_fused_params(params)

    obs = jax.random.normal(xkey, (batch, shared_dims[0]), jnp.float32)

    fwd_both = jax.jit(lambda o: actor_critic_forward_both(fused, o))
    policy_out, value_out = fwd_both(obs)
    jax.block_until_ready(policy_out)
    jax.block_until_ready(value_out)
    assert policy_out.shape == (batch, policy_dims[-1])
    assert value_out.shape == (batch, value_dims[-1])

    # Tight check vs a reference using the SAME bf16 matmul operands as the kernel.
    _check("policy(bf16 ref)", policy_out, ref_forward(params, obs, True, jnp.bfloat16), 5e-3, 5e-3)
    _check("value(bf16 ref)", value_out, ref_forward(params, obs, False, jnp.bfloat16), 5e-3, 5e-3)
    # Loose sanity check vs the pure-f32 reference (bf16 MXU operands change numerics slightly).
    _check("policy(f32 ref)", policy_out, ref_forward(params, obs, True), 5e-2, 5e-2)
    _check("value(f32 ref)", value_out, ref_forward(params, obs, False), 5e-2, 5e-2)

    # Original single-head API (calculate_policy flag) still supported.
    p_only = actor_critic_forward(fused, obs, calculate_policy=True)
    v_only = actor_critic_forward(fused, obs, calculate_policy=False)
    _check("policy(flag)", p_only, ref_forward(params, obs, True, jnp.bfloat16), 5e-3, 5e-3)
    _check("value(flag)", v_only, ref_forward(params, obs, False, jnp.bfloat16), 5e-3, 5e-3)

    # Gridded / pipelined large-batch path: two 512-row tiles.
    obs_big = jax.random.normal(bkey, (1024, shared_dims[0]), jnp.float32)
    p_big, v_big = actor_critic_forward_both(fused, obs_big)
    jax.block_until_ready(p_big)
    jax.block_until_ready(v_big)
    _check("policy(big)", p_big, ref_forward(params, obs_big, True, jnp.bfloat16), 5e-3, 5e-3)
    _check("value(big)", v_big, ref_forward(params, obs_big, False, jnp.bfloat16), 5e-3, 5e-3)

    # Unequal head depths + single shared layer exercise the identity-prefix
    # head fusion and the dummy trunk-rest path.
    key, pkey2, xkey2 = jax.random.split(key, 3)
    params2 = init_actor_critic_params(pkey2, [12, 24], [16, 1], [20, 20, 6])
    fused2 = prepare_fused_params(params2)
    obs2 = jax.random.normal(xkey2, (16, 12), jnp.float32)
    p2, v2 = actor_critic_forward_both(fused2, obs2)
    jax.block_until_ready(p2)
    jax.block_until_ready(v2)
    assert p2.shape == (16, 6) and v2.shape == (16, 1)
    _check("policy(uneven)", p2, ref_forward(params2, obs2, True, jnp.bfloat16), 5e-3, 5e-3)
    _check("value(uneven)", v2, ref_forward(params2, obs2, False, jnp.bfloat16), 5e-3, 5e-3)

    print("KERNEL_OK")
</pallas_src>

<mosaic_0001>
module attributes {stable_mosaic.version = 11 : i64} {
  func.func @_fused_actor_critic_kernel(%arg0: i32, %arg1: memref<2x16xf32, #tpu.memory_space<vmem>>, %arg2: memref<16x128xbf16, #tpu.memory_space<vmem>>, %arg3: memref<1x128x128xbf16, #tpu.memory_space<vmem>>, %arg4: memref<2x128xf32, #tpu.memory_space<vmem>>, %arg5: memref<128x128xbf16, #tpu.memory_space<vmem>>, %arg6: memref<1x128x128xbf16, #tpu.memory_space<vmem>>, %arg7: memref<2x128xf32, #tpu.memory_space<vmem>>, %arg8: memref<2x128xf32, #tpu.memory_space<vmem>>) attributes {dimension_semantics = [#tpu.dimension_semantics<parallel>], iteration_bounds = array<i64: 1>, scalar_prefetch = 0 : i64, scratch_operands = 0 : i64, tpu.core_type = #tpu.core_type<tc>, window_params = [{transform_indices = @transform_0, window_bounds = array<i64: 2, 16>}, {pipeline_mode = #tpu.pipeline_mode<synchronous>, transform_indices = @transform_1, window_bounds = array<i64: 16, 128>}, {pipeline_mode = #tpu.pipeline_mode<synchronous>, transform_indices = @transform_2, window_bounds = array<i64: 1, 128, 128>}, {pipeline_mode = #tpu.pipeline_mode<synchronous>, transform_indices = @transform_3, window_bounds = array<i64: 2, 128>}, {pipeline_mode = #tpu.pipeline_mode<synchronous>, transform_indices = @transform_4, window_bounds = array<i64: 128, 128>}, {pipeline_mode = #tpu.pipeline_mode<synchronous>, transform_indices = @transform_5, window_bounds = array<i64: 1, 128, 128>}, {pipeline_mode = #tpu.pipeline_mode<synchronous>, transform_indices = @transform_6, window_bounds = array<i64: 2, 128>}, {transform_indices = @transform_7, window_bounds = array<i64: 2, 128>}]} {
    %c0 = arith.constant 0 : index
    %c0_0 = arith.constant 0 : index
    %0 = vector.load %arg1[%c0, %c0_0] : memref<2x16xf32, #tpu.memory_space<vmem>>, vector<2x16xf32>
    %1 = arith.truncf %0 : vector<2x16xf32> to vector<2x16xbf16>
    %c0_1 = arith.constant 0 : index
    %c0_2 = arith.constant 0 : index
    %2 = vector.load %arg2[%c0_1, %c0_2] : memref<16x128xbf16, #tpu.memory_space<vmem>>, vector<16x128xbf16>
    %cst = arith.constant dense<0.000000e+00> : vector<2x128xf32>
    %3 = tpu.matmul %1, %2, %cst {dimension_numbers = #tpu.dot_dimension_numbers<[1], [0], [0], [1], [0, 0, 1, 1], [], []>} : vector<2x16xbf16>, vector<16x128xbf16>, vector<2x128xf32> -> vector<2x128xf32>
    %c0_3 = arith.constant 0 : index
    %c0_4 = arith.constant 0 : index
    %4 = vector.load %arg4[%c0_3, %c0_4] : memref<2x128xf32, #tpu.memory_space<vmem>>, vector<1x128xf32>
    %5 = vector.broadcast %4 : vector<1x128xf32> to vector<2x128xf32>
    %6 = arith.addf %3, %5 : vector<2x128xf32>
    %cst_5 = arith.constant 0.000000e+00 : f32
    %7 = vector.broadcast %cst_5 : f32 to vector<2x128xf32>
    %8 = arith.maximumf %6, %7 : vector<2x128xf32>
    %9 = arith.truncf %8 : vector<2x128xf32> to vector<2x128xbf16>
    %c0_6 = arith.constant 0 : index
    %c0_7 = arith.constant 0 : index
    %c0_8 = arith.constant 0 : index
    %10 = vector.load %arg3[%c0_6, %c0_7, %c0_8] : memref<1x128x128xbf16, #tpu.memory_space<vmem>>, vector<1x128x128xbf16>
    %11 = vector.shape_cast %10 : vector<1x128x128xbf16> to vector<128x128xbf16>
    %cst_9 = arith.constant dense<0.000000e+00> : vector<2x128xf32>
    %12 = tpu.matmul %9, %11, %cst_9 {dimension_numbers = #tpu.dot_dimension_numbers<[1], [0], [0], [1], [0, 0, 1, 1], [], []>} : vector<2x128xbf16>, vector<128x128xbf16>, vector<2x128xf32> -> vector<2x128xf32>
    %c1 = arith.constant 1 : index
    %c0_10 = arith.constant 0 : index
    %13 = vector.load %arg4[%c1, %c0_10] : memref<2x128xf32, #tpu.memory_space<vmem>>, vector<1x128xf32>
    %14 = vector.broadcast %13 : vector<1x128xf32> to vector<2x128xf32>
    %15 = arith.addf %12, %14 : vector<2x128xf32>
    %cst_11 = arith.constant 0.000000e+00 : f32
    %16 = vector.broadcast %cst_11 : f32 to vector<2x128xf32>
    %17 = arith.maximumf %15, %16 : vector<2x128xf32>
    %18 = arith.truncf %17 : vector<2x128xf32> to vector<2x128xbf16>
    %c0_12 = arith.constant 0 : index
    %c0_13 = arith.constant 0 : index
    %19 = vector.load %arg5[%c0_12, %c0_13] : memref<128x128xbf16, #tpu.memory_space<vmem>>, vector<128x128xbf16>
    %cst_14 = arith.constant dense<0.000000e+00> : vector<2x128xf32>
    %20 = tpu.matmul %18, %19, %cst_14 {dimension_numbers = #tpu.dot_dimension_numbers<[1], [0], [0], [1], [0, 0, 1, 1], [], []>} : vector<2x128xbf16>, vector<128x128xbf16>, vector<2x128xf32> -> vector<2x128xf32>
    %c0_15 = arith.constant 0 : index
    %c0_16 = arith.constant 0 : index
    %21 = vector.load %arg7[%c0_15, %c0_16] : memref<2x128xf32, #tpu.memory_space<vmem>>, vector<1x128xf32>
    %22 = vector.broadcast %21 : vector<1x128xf32> to vector<2x128xf32>
    %23 = arith.addf %20, %22 : vector<2x128xf32>
    %cst_17 = arith.constant 0.000000e+00 : f32
    %24 = vector.broadcast %cst_17 : f32 to vector<2x128xf32>
    %25 = arith.maximumf %23, %24 : vector<2x128xf32>
    %26 = arith.truncf %25 : vector<2x128xf32> to vector<2x128xbf16>
    %c0_18 = arith.constant 0 : index
    %c0_19 = arith.constant 0 : index
    %c0_20 = arith.constant 0 : index
    %27 = vector.load %arg6[%c0_18, %c0_19, %c0_20] : memref<1x128x128xbf16, #tpu.memory_space<vmem>>, vector<1x128x128xbf16>
    %28 = vector.shape_cast %27 : vector<1x128x128xbf16> to vector<128x128xbf16>
    %cst_21 = arith.constant dense<0.000000e+00> : vector<2x128xf32>
    %29 = tpu.matmul %26, %28, %cst_21 {dimension_numbers = #tpu.dot_dimension_numbers<[1], [0], [0], [1], [0, 0, 1, 1], [], []>} : vector<2x128xbf16>, vector<128x128xbf16>, vector<2x128xf32> -> vector<2x128xf32>
    %c1_22 = arith.constant 1 : index
    %c0_23 = arith.constant 0 : index
    %30 = vector.load %arg7[%c1_22, %c0_23] : memref<2x128xf32, #tpu.memory_space<vmem>>, vector<1x128xf32>
    %31 = vector.broadcast %30 : vector<1x128xf32> to vector<2x128xf32>
    %32 = arith.addf %29, %31 : vector<2x128xf32>
    %c0_24 = arith.constant 0 : index
    %c0_25 = arith.constant 0 : index
    %33 = vector.load %arg8[%c0_24, %c0_25] : memref<2x128xf32, #tpu.memory_space<vmem>>, vector<2x128xf32>
    tpu.vector_store %arg8[%c0_24, %c0_25], %32 {strides = array<i32>} : memref<2x128xf32, #tpu.memory_space<vmem>>, vector<2x128xf32>,
    return
  }
  func.func @transform_0(%arg0: i32) -> (i32, i32) {
    %c0_i32 = arith.constant 0 : i32
    %c0_i32_0 = arith.constant 0 : i32
    return %arg0, %c0_i32 : i32, i32
  }
  func.func @transform_1(%arg0: i32) -> (i32, i32) {
    %c0_i32 = arith.constant 0 : i32
    %c0_i32_0 = arith.constant 0 : i32
    %c0_i32_1 = arith.constant 0 : i32
    return %c0_i32, %c0_i32_0 : i32, i32
  }
  func.func @transform_2(%arg0: i32) -> (i32, i32, i32) {
    %c0_i32 = arith.constant 0 : i32
    %c0_i32_0 = arith.constant 0 : i32
    %c0_i32_1 = arith.constant 0 : i32
    %c0_i32_2 = arith.constant 0 : i32
    return %c0_i32, %c0_i32_0, %c0_i32_1 : i32, i32, i32
  }
  func.func @transform_3(%arg0: i32) -> (i32, i32) {
    %c0_i32 = arith.constant 0 : i32
    %c0_i32_0 = arith.constant 0 : i32
    %c0_i32_1 = arith.constant 0 : i32
    return %c0_i32, %c0_i32_0 : i32, i32
  }
  func.func @transform_4(%arg0: i32) -> (i32, i32) {
    %c0_i32 = arith.constant 0 : i32
    %c0_i32_0 = arith.constant 0 : i32
    %c0_i32_1 = arith.constant 0 : i32
    return %c0_i32, %c0_i32_0 : i32, i32
  }
  func.func @transform_5(%arg0: i32) -> (i32, i32, i32) {
    %c0_i32 = arith.constant 0 : i32
    %c0_i32_0 = arith.constant 0 : i32
    %c0_i32_1 = arith.constant 0 : i32
    %c0_i32_2 = arith.constant 0 : i32
    return %c0_i32, %c0_i32_0, %c0_i32_1 : i32, i32, i32
  }
  func.func @transform_6(%arg0: i32) -> (i32, i32) {
    %c0_i32 = arith.constant 0 : i32
    %c0_i32_0 = arith.constant 0 : i32
    %c0_i32_1 = arith.constant 0 : i32
    return %c0_i32, %c0_i32_0 : i32, i32
  }
  func.func @transform_7(%arg0: i32) -> (i32, i32) {
    %c0_i32 = arith.constant 0 : i32
    %c0_i32_0 = arith.constant 0 : i32
    return %arg0, %c0_i32 : i32, i32
  }
}

</mosaic_0001>

<bundles_post_ra>
// kernel: _lambda_.1
= control target key start
LH: loop header
LB: loop body
LE: loop exit
PB: predicated region body
PF: predicated region fallthrough
CT: control target
= control target key end

     0   :  { %12 = vsyncpa [#allocation3], 0  ;;  %s775_s0 = inlined_call_operand.hbm [shape: f32[2,16], index: 0, kind: input, shape index: {}]   ;;  %s776_s1 = inlined_call_operand.hbm [shape: bf16[16,128], index: 1, kind: input, shape index: {}]   ;;  %s777_s2 = inlined_call_operand.hbm [shape: bf16[1,128,128], index: 2, kind: input, shape index: {}]   ;;  %s778_s3 = inlined_call_operand.hbm [shape: f32[2,128], index: 3, kind: input, shape index: {}]   ;;  %s779_s4 = inlined_call_operand.hbm [shape: bf16[128,128], index: 4, kind: input, shape index: {}]   ;;  %s780_s5 = inlined_call_operand.hbm [shape: bf16[1,128,128], index: 5, kind: input, shape index: {}]   ;;  %s781_s6 = inlined_call_operand.vmem [shape: f32[2,128], index: 6, kind: input, shape index: {}]   ;;  %s782_s7 = inlined_call_operand.vmem [shape: f32[2,128], index: 7, kind: output, shape index: {}]  }
   0x1   :  { %13 = vsyncpa [#allocation5], 0 }
   0x2   :  { %14 = vsyncpa [#allocation8], 0  ;;  %s31_s26 = sshll.u32 %s776_s1, 4  ;;  %s32_s26 = int_to_ptr.hbm [resolvable:$true] %s31_s26 }
   0x3   :  { %15 = vsyncpa [#allocation11], 0  ;;  %s688_s27 = smov [#allocation4]   ;;  %s58_s8 = sshll.u32 %s778_s3, 4  ;;  %s59_s8 = int_to_ptr.hbm [resolvable:$true] %s58_s8 }
   0x4   :  { %s33_s28 = sshll.u32 %s688_s27, 4  ;;  %s689_s9 = smov 64   ;;  %s34_s28 = int_to_ptr.vmem [resolvable:$true] %s33_s28 }
   0x5   :  { %s690_s10 = smov 4   ;;  %s691_s11 = smov [#allocation7]  }
   0x6   :  { %39 = dma.hbm_to_vmem [thread:$0]  %s32_s26, 128, %s34_s28, [#allocation5], %s689_s9, %s689_s9, %s690_s10  }
   0x7   :  { %s60_s12 = sshll.u32 %s691_s11, 4  ;;  %s21_s14 = sshll.u32 %s775_s0, 4  ;;  %s61_s12 = int_to_ptr.vmem [resolvable:$true] %s60_s12  ;;  %s22_s14 = int_to_ptr.hbm [resolvable:$true] %s21_s14 }
   0x8   :  { %63 = dma.hbm_to_vmem [thread:$0]  %s59_s8, 32, %s61_s12, [#allocation8]  }
   0x9   :  { %s44_s3 = sshll.u32 %s777_s2, 4  ;;  %s692_s17 = smov [#allocation2]   ;;  %s45_s3 = int_to_ptr.hbm [resolvable:$true] %s44_s3 }
   0xa   :  { %s23_s18 = sshll.u32 %s692_s17, 4  ;;  %s693_s19 = smov [#allocation6]   ;;  %s24_s18 = int_to_ptr.vmem [resolvable:$true] %s23_s18 }
   0xb   :  { %26 = dma.hbm_to_vmem [thread:$0]  %s22_s14, 32, %s24_s18, [#allocation3]  }
   0xc   :  { %s46_s20 = sshll.u32 %s693_s19, 4  ;;  %s68_s23 = sshll.u32 %s779_s4, 4  ;;  %s47_s20 = int_to_ptr.vmem [resolvable:$true] %s46_s20  ;;  %s69_s23 = int_to_ptr.hbm [resolvable:$true] %s68_s23 }
   0xd   :  { %52 = dma.hbm_to_vmem [thread:$0]  %s45_s3, 1024, %s47_s20, [#allocation5], %s689_s9, %s689_s9, %s690_s10  }
   0xe   :  { %s81_s2 = sshll.u32 %s780_s5, 4  ;;  %s694_s25 = smov [#allocation9]   ;;  %s82_s2 = int_to_ptr.hbm [resolvable:$true] %s81_s2 }
   0xf   :  { %s70_s26 = sshll.u32 %s694_s25, 4  ;;  %s695_s27 = smov [#allocation10]   ;;  %s71_s26 = int_to_ptr.vmem [resolvable:$true] %s70_s26 }
  0x10   :  { %76 = dma.hbm_to_vmem [thread:$0]  %s69_s23, 1024, %s71_s26, [#allocation8], %s689_s9, %s689_s9, %s690_s10  }
  0x11   :  { %s83_s4 = sshll.u32 %s695_s27, 4  ;;  %s84_s4 = int_to_ptr.vmem [resolvable:$true] %s83_s4 }
  0x12   :  { %89 = dma.hbm_to_vmem [thread:$0]  %s82_s2, 1024, %s84_s4, [#allocation11], %s689_s9, %s689_s9, %s690_s10  }
  0x13   :  { %680 = dma.done.wait [#allocation3], 32  }
  0x14   :  { %681 = vsyncadd [#allocation3], 4294967264 }
  0x15   :  { %682 = dma.done.wait [#allocation5], 1152  }
  0x16   :  { %683 = vsyncadd [#allocation5], 4294966144 }
  0x17   :  { %684 = dma.done.wait [#allocation8], 1056  }
  0x18   :  { %685 = vsyncadd [#allocation8], 4294966240 }
  0x19   :  { %686 = dma.done.wait [#allocation11], 1024  }
  0x1a   :  { %687 = vsyncadd [#allocation11], 4294966272  ;;  %v499_v0 = vld [vmem:[#allocation4] sm:$0xff]  ;;  %v117_v1 = vld [vmem:[#allocation2] sm:$0x3]  ;;  %vm129_vm0 = vcmask 130048  }
  0x1b   :  { %v507_v2 = vld [vmem:[#allocation6 + $0x38] sm:$0xff]  ;;  %v118_v3 = vpack.c.bf16 %v117_v1, %v117_v1  ;;  %140 = vmatpush.bf16.msra.mxu0 %v499_v0  ;;  %v506_v4 = vld [vmem:[#allocation6 + $0x30] sm:$0xff]  ;;  %v505_v5 = vld [vmem:[#allocation6 + $0x28] sm:$0xff] }
  0x1c   :  { %214 = vmatpush.bf16.msra.mxu1 %v507_v2  ;;  %v504_v6 = vld [vmem:[#allocation6 + $0x20] sm:$0xff]  ;;  %v503_v7 = vld [vmem:[#allocation6 + $0x18] sm:$0xff]  ;;  %v502_v8 = vld [vmem:[#allocation6 + $0x10] sm:$0xff] }
  0x1d   :  { %v501_v9 = vld [vmem:[#allocation6 + $0x8] sm:$0xff]  ;;  %v500_v10 = vld [vmem:[#allocation6] sm:$0xff]  ;;  %v514_v12 = vld [vmem:[#allocation9 + $0x30] sm:$0xff] }
  0x1e   :  { %402 = vmatmul.msk.bf16.vlgmr.msra.gmra.mxu0 %vm129_vm0, %v118_v3  ;;  %v515_v11 = vld [vmem:[#allocation9 + $0x38] sm:$0xff]  ;;  %v513_v13 = vld [vmem:[#allocation9 + $0x28] sm:$0xff]  ;;  %v512_v14 = vld [vmem:[#allocation9 + $0x20] sm:$0xff] }
  0x1f   :  { %295 = vmatpush.bf16.msra.mxu2 %v515_v11  ;;  %v511_v15 = vld [vmem:[#allocation9 + $0x18] sm:$0xff]  ;;  %v510_v16 = vld [vmem:[#allocation9 + $0x10] sm:$0xff]  ;;  %v509_v23 = vld [vmem:[#allocation9 + $0x8] sm:$0xff] }
  0x20   :  { %215 = vmatpush.bf16.msra.mxu1 %v506_v4  ;;  %v532_v17 = vld [vmem:[#allocation7] ss:$0 sm:$0xff]  ;;  %v508_v24 = vld [vmem:[#allocation9] sm:$0xff]  ;;  %v522_v26 = vld [vmem:[#allocation10 + $0x30] sm:$0xff] }
  0x21   :  { %v523_v25 = vld [vmem:[#allocation10 + $0x38] sm:$0xff]  ;;  %v521_v27 = vld [vmem:[#allocation10 + $0x28] sm:$0xff]  ;;  %v520_v28 = vld [vmem:[#allocation10 + $0x20] sm:$0xff] }
  0x22   :  { %376 = vmatpush.bf16.msra.mxu3 %v523_v25  ;;  %v519_v29 = vld [vmem:[#allocation10 + $0x18] sm:$0xff]  ;;  %v518_v30 = vld [vmem:[#allocation10 + $0x10] sm:$0xff]  ;;  %v517_v37 = vld [vmem:[#allocation10 + $0x8] sm:$0xff] }
  0x23   :  { %296 = vmatpush.bf16.msra.mxu2 %v514_v12  ;;  %v533_v31 = vld [vmem:[#allocation7 + $0x1] ss:$0 sm:$0xff]  ;;  %v516_v38 = vld [vmem:[#allocation10] sm:$0xff]  ;;  %v534_v39 = vld [vmem:[%s781_s6] ss:$0 sm:$0xff] }
  0x24   :  { %216 = vmatpush.bf16.msra.mxu1 %v505_v5  ;;  %v535_v45 = vld [vmem:[%s781_s6 + $0x1] ss:$0 sm:$0xff] }
  0x26   :  { %377 = vmatpush.bf16.msra.mxu3 %v522_v26 }
  0x27   :  { %297 = vmatpush.bf16.msra.mxu2 %v513_v13 }
  0x28   :  { %217 = vmatpush.bf16.msra.mxu1 %v504_v6 }
  0x2a   :  { %378 = vmatpush.bf16.msra.mxu3 %v521_v27 }
  0x2b   :  { %298 = vmatpush.bf16.msra.mxu2 %v512_v14 }
  0x2c   :  { %218 = vmatpush.bf16.msra.mxu1 %v503_v7 }
  0x2e   :  { %379 = vmatpush.bf16.msra.mxu3 %v520_v28 }
  0x2f   :  { %299 = vmatpush.bf16.msra.mxu2 %v511_v15 }
  0x30   :  { %219 = vmatpush.bf16.msra.mxu1 %v502_v8 }
  0x32   :  { %380 = vmatpush.bf16.msra.mxu3 %v519_v29 }
  0x33   :  { %300 = vmatpush.bf16.msra.mxu2 %v510_v16 }
  0x34   :  { %220 = vmatpush.bf16.msra.mxu1 %v501_v9 }
  0x36   :  { %381 = vmatpush.bf16.msra.mxu3 %v518_v30 }
  0x37   :  { %301 = vmatpush.bf16.msra.mxu2 %v509_v23 }
  0x38   :  { %221 = vmatpush.bf16.msra.mxu1 %v500_v10 }
  0x3a   :  { %382 = vmatpush.bf16.msra.mxu3 %v517_v37 }
  0x3b   :  { %302 = vmatpush.bf16.msra.mxu2 %v508_v24 }
  0x3e   :  { %383 = vmatpush.bf16.msra.mxu3 %v516_v38 }
  0x9b   :  { %v142_v18 = vpop.f32.mrf.mxu0 }
  0x9c   :  { %v143_v19 = vadd.f32 %v532_v17, %v142_v18 }
  0x9e   :  { %v146_v20 = vmax.f32 %v143_v19, 0.0 }
  0xa0   :  { %v147_v21 = vpack.c.bf16 %v146_v20, %v146_v20 }
  0xa2   :  { %222 = vmatmul.bf16.vlgmr.msra.gmra.mxu1 %v147_v21 }
  0xa3   :  { %v144_v22 = vpop.f32.mrf.mxu0 }
 0x11f   :  { %v223_v32 = vpop.f32.mrf.mxu1 }
 0x120   :  { %v224_v33 = vadd.f32 %v533_v31, %v223_v32 }
 0x122   :  { %v227_v34 = vmax.f32 %v224_v33, 0.0 }
 0x124   :  { %v228_v35 = vpack.c.bf16 %v227_v34, %v227_v34 }
 0x126   :  { %303 = vmatmul.bf16.vlgmr.msra.gmra.mxu2 %v228_v35 }
 0x127   :  { %v225_v36 = vpop.f32.mrf.mxu1 }
 0x1a9   :  { %v304_v40 = vpop.f32.mrf.mxu2 }
 0x1aa   :  { %v305_v41 = vadd.f32 %v534_v39, %v304_v40 }
 0x1ac   :  { %v308_v42 = vmax.f32 %v305_v41, 0.0 }
 0x1ae   :  { %v309_v43 = vpack.c.bf16 %v308_v42, %v308_v42 }
 0x1b0   :  { %384 = vmatmul.bf16.vlgmr.msra.gmra.mxu3 %v309_v43 }
 0x1b1   :  { %v306_v44 = vpop.f32.mrf.mxu2 }
 0x233   :  { %v385_v46 = vpop.f32.mrf.mxu3 }
 0x234   :  { %v386_v47 = vadd.f32 %v535_v45, %v385_v46 }
 0x236   :  { %389 = vst [vmem:[%s782_s7] sm:$0x3] %v386_v47 }
 0x23b   :  { %v387_v48 = vpop.f32.mrf.mxu3 }
 0x23c   :  { %394 = vsyncpa [#allocation3], 1 }
 0x23d   :  { %395 = vsyncpa [#allocation5], 1 }
 0x23e   :  { %396 = vsyncpa [#allocation8], 1 }
 0x23f   :  { %397 = vsyncpa [#allocation11], 1 }

</bundles_post_ra>
